<compile_context>
chip_gen: v7x
topology: tpu7x:2x2x1
jax: 0.10.0
libtpu: 0.0.40
codegen_flags: <defaults>
</compile_context>

<pallas_src>
import functools

import jax
import jax.numpy as jnp
from jax.experimental import pallas as pl
from jax.experimental.pallas import tpu as pltpu


# -----------------------------------------------------------------------------
# Helpers
# -----------------------------------------------------------------------------
def _reorder_ifgo_to_ifog(x):
    """Permute PyTorch gate order [i, f, g, o] -> [i, f, o, g] along axis 0."""
    H = x.shape[0] // 4
    i = x[0:H]
    f = x[H:2 * H]
    g = x[2 * H:3 * H]
    o = x[3 * H:4 * H]
    return jnp.concatenate([i, f, o, g], axis=0)


def _pick_batch_tile(bp):
    """Largest power-of-two multiple-of-8 tile that divides the padded batch."""
    for cand in (128, 64, 32, 16, 8):
        if bp % cand == 0:
            return cand
    return bp


# -----------------------------------------------------------------------------
# Phase 1: hoisted layer-1 input projection  gx = x @ W_ih1^T + (b_ih1 + b_hh1)
# One large, well-shaped MXU matmul instead of T tiny ones on the serial path.
# -----------------------------------------------------------------------------
def _proj_kernel(x_ref, w_ref, b_ref, o_ref):
    o_ref[...] = (jnp.dot(x_ref[...], w_ref[...],
                          preferred_element_type=jnp.float32)
                  + b_ref[...]).astype(o_ref.dtype)


def input_projection(x_flat, w_t_bf16, bias_f32):
    """x_flat: (N, E) ; w_t_bf16: (E, 4H) bf16 ; bias_f32: (1, 4H) -> (N, 4H) f32."""
    N, E = x_flat.shape
    fourH = w_t_bf16.shape[1]
    TN = N if N <= 512 else 512          # N is a multiple of 8 (padded batch)
    grid = (pl.cdiv(N, TN),)
    return pl.pallas_call(
        _proj_kernel,
        out_shape=jax.ShapeDtypeStruct((N, fourH), jnp.float32),
        grid_spec=pltpu.PrefetchScalarGridSpec(
            num_scalar_prefetch=0,
            grid=grid,
            in_specs=[
                pl.BlockSpec((TN, E), lambda n: (n, 0)),
                pl.BlockSpec((E, fourH), lambda n: (0, 0)),
                pl.BlockSpec((1, fourH), lambda n: (0, 0)),
            ],
            out_specs=pl.BlockSpec((TN, fourH), lambda n: (n, 0)),
        ),
        compiler_params=pltpu.CompilerParams(
            dimension_semantics=("parallel",)),
    )(x_flat.astype(jnp.bfloat16), w_t_bf16, bias_f32)


# -----------------------------------------------------------------------------
# Phase 2: fused 2-layer LSTM recurrence + final-step FC + sigmoid.
# Grid = (batch tiles [parallel], time chunks [arbitrary, sequential carry]).
# h/c for both layers carried in VMEM scratch across chunks; carried in the
# fori_loop values inside a chunk.
# -----------------------------------------------------------------------------
def _fused_lstm_fc_kernel(gx1_ref, whh1_ref, wih2_ref, whh2_ref, b2_ref,
                          wfc_ref, bfc_ref, h0_ref, c0_ref,
                          hn_ref, cn_ref, sig_ref,
                          h1_scr, c1_scr, h2_scr, c2_scr,
                          *, hidden_dim, seq_len, time_chunk):
    c_idx = pl.program_id(1)
    n_chunks = pl.num_programs(1)
    H = hidden_dim

    @pl.when(c_idx == 0)
    def _():
        h1_scr[...] = h0_ref[0]
        c1_scr[...] = c0_ref[0]
        h2_scr[...] = h0_ref[1]
        c2_scr[...] = c0_ref[1]

    # Weights loaded once per chunk (hoisted out of the time loop).
    whh1 = whh1_ref[...]        # (H, 4H) bf16
    wih2 = wih2_ref[...]        # (H, 4H) bf16
    whh2 = whh2_ref[...]        # (H, 4H) bf16
    b2 = b2_ref[...]            # (1, 4H) f32

    def cell(gates, c_prev):
        # gate order is [i, f, o | g]  (reordered host-side)
        ifo = jax.nn.sigmoid(gates[:, :3 * H])
        g = jnp.tanh(gates[:, 3 * H:])
        i_g = ifo[:, :H]
        f_g = ifo[:, H:2 * H]
        o_g = ifo[:, 2 * H:3 * H]
        c_new = f_g * c_prev + i_g * g
        h_new = o_g * jnp.tanh(c_new)
        return h_new, c_new

    def step(t, carry):
        h1, c1, h2, c2 = carry
        step_idx = c_idx * time_chunk + t

        # ----- layer 1: input projection was precomputed (gx1), only h @ W_hh
        gates1 = gx1_ref[t] + jnp.dot(h1.astype(jnp.bfloat16), whh1,
                                      preferred_element_type=jnp.float32)
        h1n, c1n = cell(gates1, c1)

        # ----- layer 2: input is layer-1's fresh h (stays on-chip)
        gates2 = (jnp.dot(h1n.astype(jnp.bfloat16), wih2,
                          preferred_element_type=jnp.float32)
                  + jnp.dot(h2.astype(jnp.bfloat16), whh2,
                            preferred_element_type=jnp.float32)
                  + b2)
        h2n, c2n = cell(gates2, c2)

        # Mask out-of-range steps of a partial final chunk.
        valid = step_idx < seq_len
        h1 = jnp.where(valid, h1n, h1)
        c1 = jnp.where(valid, c1n, c1)
        h2 = jnp.where(valid, h2n, h2)
        c2 = jnp.where(valid, c2n, c2)
        return h1, c1, h2, c2

    carry0 = (h1_scr[...], c1_scr[...], h2_scr[...], c2_scr[...])
    h1, c1, h2, c2 = jax.lax.fori_loop(0, time_chunk, step, carry0,
                                       unroll=True)

    h1_scr[...] = h1
    c1_scr[...] = c1
    h2_scr[...] = h2
    c2_scr[...] = c2

    @pl.when(c_idx == n_chunks - 1)
    def _():
        hn_ref[0] = h1
        hn_ref[1] = h2
        cn_ref[0] = c1
        cn_ref[1] = c2
        # Final-step FC + sigmoid fused here (only the last timestep matters).
        logits = jnp.dot(h2.astype(jnp.bfloat16), wfc_ref[...],
                         preferred_element_type=jnp.float32) + bfc_ref[...]
        sig_ref[...] = jax.nn.sigmoid(logits).astype(sig_ref.dtype)


def fused_lstm_fc(gx1, whh1_t, wih2_t, whh2_t, b2, wfc_t, bfc, h0, c0, *, T, H):
    """gx1: (T, Bp, 4H) f32 precomputed layer-1 gates; returns h_n, c_n, sig."""
    _, Bp, fourH = gx1.shape
    O = wfc_t.shape[1]
    BB = _pick_batch_tile(Bp)
    TC = min(T, 16)
    grid = (Bp // BB, pl.cdiv(T, TC))

    kernel = functools.partial(_fused_lstm_fc_kernel, hidden_dim=H,
                               seq_len=T, time_chunk=TC)

    return pl.pallas_call(
        kernel,
        out_shape=(
            jax.ShapeDtypeStruct((2, Bp, H), jnp.float32),   # h_n
            jax.ShapeDtypeStruct((2, Bp, H), jnp.float32),   # c_n
            jax.ShapeDtypeStruct((Bp, O), jnp.float32),      # sigmoid(fc(h_T))
        ),
        grid_spec=pltpu.PrefetchScalarGridSpec(
            num_scalar_prefetch=0,
            grid=grid,
            in_specs=[
                pl.BlockSpec((TC, BB, fourH), lambda b, c: (c, b, 0)),  # gx1
                pl.BlockSpec((H, fourH), lambda b, c: (0, 0)),          # W_hh1^T
                pl.BlockSpec((H, fourH), lambda b, c: (0, 0)),          # W_ih2^T
                pl.BlockSpec((H, fourH), lambda b, c: (0, 0)),          # W_hh2^T
                pl.BlockSpec((1, fourH), lambda b, c: (0, 0)),          # bias2
                pl.BlockSpec((H, O), lambda b, c: (0, 0)),              # W_fc^T
                pl.BlockSpec((1, O), lambda b, c: (0, 0)),              # b_fc
                pl.BlockSpec((2, BB, H), lambda b, c: (0, b, 0)),       # h0
                pl.BlockSpec((2, BB, H), lambda b, c: (0, b, 0)),       # c0
            ],
            out_specs=[
                pl.BlockSpec((2, BB, H), lambda b, c: (0, b, 0)),       # h_n
                pl.BlockSpec((2, BB, H), lambda b, c: (0, b, 0)),       # c_n
                pl.BlockSpec((BB, O), lambda b, c: (b, 0)),             # sig
            ],
            scratch_shapes=[
                pltpu.VMEM((BB, H), jnp.float32),   # h1 carry
                pltpu.VMEM((BB, H), jnp.float32),   # c1 carry
                pltpu.VMEM((BB, H), jnp.float32),   # h2 carry
                pltpu.VMEM((BB, H), jnp.float32),   # c2 carry
            ],
        ),
        compiler_params=pltpu.CompilerParams(
            dimension_semantics=("parallel", "arbitrary")),
    )(gx1, whh1_t, wih2_t, whh2_t, b2, wfc_t, bfc, h0, c0)


# -----------------------------------------------------------------------------
# Parameters (same layout as PyTorch's SentimentRNN).
# -----------------------------------------------------------------------------
class SentimentRNNParams:
    def __init__(self, key, vocab_size, output_size, embedding_dim,
                 hidden_dim, n_layers):
        self.vocab_size = vocab_size
        self.output_size = output_size
        self.embedding_dim = embedding_dim
        self.hidden_dim = hidden_dim
        self.n_layers = n_layers

        keys = jax.random.split(key, 2 + 4 * n_layers + 2)
        k = iter(keys)
        self.embedding = jax.random.normal(
            next(k), (vocab_size, embedding_dim), jnp.float32) * 0.1

        bound = 1.0 / jnp.sqrt(hidden_dim)
        self.lstm = []
        for layer in range(n_layers):
            in_f = embedding_dim if layer == 0 else hidden_dim
            w_ih = jax.random.uniform(next(k), (4 * hidden_dim, in_f),
                                      jnp.float32, -bound, bound)
            w_hh = jax.random.uniform(next(k), (4 * hidden_dim, hidden_dim),
                                      jnp.float32, -bound, bound)
            b_ih = jax.random.uniform(next(k), (4 * hidden_dim,),
                                      jnp.float32, -bound, bound)
            b_hh = jax.random.uniform(next(k), (4 * hidden_dim,),
                                      jnp.float32, -bound, bound)
            self.lstm.append((w_ih, w_hh, b_ih, b_hh))

        fc_bound = 1.0 / jnp.sqrt(hidden_dim)
        self.w_fc = jax.random.uniform(next(k), (output_size, hidden_dim),
                                       jnp.float32, -fc_bound, fc_bound)
        self.b_fc = jax.random.uniform(next(k), (output_size,),
                                       jnp.float32, -fc_bound, fc_bound)

    def init_hidden(self, batch_size):
        shape = (self.n_layers, batch_size, self.hidden_dim)
        return (jnp.zeros(shape, jnp.float32), jnp.zeros(shape, jnp.float32))


# -----------------------------------------------------------------------------
# Full SentimentRNN forward.
# -----------------------------------------------------------------------------
def sentiment_rnn_forward(params, x_tokens, hidden):
    """x_tokens: (B, T) int32 token ids; hidden: (h0, c0) each (L, B, H)."""
    assert params.n_layers == 2, "fused kernel is specialized to n_layers == 2"
    h0_all, c0_all = hidden
    B, T = x_tokens.shape
    H = params.hidden_dim
    E = params.embedding_dim
    O = params.output_size

    # Pad batch to a multiple of 8 for sublane-dense tiles; padded rows are
    # zero-input and get sliced off before returning.
    Bp = ((B + 7) // 8) * 8
    pad_b = Bp - B

    # Embedding lookup (gather) kept as JAX glue; transpose the *token ids*
    # (tiny) so the gather lands directly in time-major (T, B, E) — no
    # activation-tensor transposes.
    # TODO(synk): embedding gather could be fused via scalar-prefetch + Element
    # row gather; kept as jnp.take for simplicity.
    tok_tb = jnp.transpose(x_tokens)                          # (T, B)
    embeds = jnp.take(params.embedding, tok_tb, axis=0)       # (T, B, E)
    if pad_b:
        embeds = jnp.pad(embeds, ((0, 0), (0, pad_b), (0, 0)))
        h0_all = jnp.pad(h0_all, ((0, 0), (0, pad_b), (0, 0)))
        c0_all = jnp.pad(c0_all, ((0, 0), (0, pad_b), (0, 0)))

    # ---- weight prep: gate reorder [i,f,g,o] -> [i,f,o,g], transpose, bf16 ----
    w_ih1, w_hh1, b_ih1, b_hh1 = params.lstm[0]
    w_ih2, w_hh2, b_ih2, b_hh2 = params.lstm[1]

    wih1_t = jnp.transpose(_reorder_ifgo_to_ifog(w_ih1)).astype(jnp.bfloat16)  # (E,4H)
    whh1_t = jnp.transpose(_reorder_ifgo_to_ifog(w_hh1)).astype(jnp.bfloat16)  # (H,4H)
    b1 = _reorder_ifgo_to_ifog(b_ih1 + b_hh1).reshape(1, 4 * H).astype(jnp.float32)

    wih2_t = jnp.transpose(_reorder_ifgo_to_ifog(w_ih2)).astype(jnp.bfloat16)  # (H,4H)
    whh2_t = jnp.transpose(_reorder_ifgo_to_ifog(w_hh2)).astype(jnp.bfloat16)  # (H,4H)
    b2 = _reorder_ifgo_to_ifog(b_ih2 + b_hh2).reshape(1, 4 * H).astype(jnp.float32)

    wfc_t = jnp.transpose(params.w_fc).astype(jnp.bfloat16)                    # (H,O)
    bfc = params.b_fc.reshape(1, O).astype(jnp.float32)

    # ---- phase 1: hoisted layer-1 input projection (one big matmul) ----
    gx1 = input_projection(embeds.reshape(T * Bp, E), wih1_t, b1)    # (T*Bp,4H)
    gx1 = gx1.reshape(T, Bp, 4 * H)

    # ---- phase 2: fused 2-layer recurrence + final-step FC + sigmoid ----
    h_n, c_n, sig = fused_lstm_fc(gx1, whh1_t, wih2_t, whh2_t, b2, wfc_t, bfc,
                                  h0_all.astype(jnp.float32),
                                  c0_all.astype(jnp.float32),
                                  T=T, H=H)

    # PyTorch: sig_out.view(B, -1)[:, -1]  ==  last output unit @ last timestep.
    sig_out = sig[:B, -1]                                            # (B,)
    return sig_out, (h_n[:, :B, :], c_n[:, :B, :])


# -----------------------------------------------------------------------------
# Pure-JAX reference (f32), for correctness validation.
# -----------------------------------------------------------------------------
def _reference_forward(params, x_tokens, hidden):
    h0_all, c0_all = hidden
    B, T = x_tokens.shape
    H = params.hidden_dim
    embeds = jnp.take(params.embedding, x_tokens, axis=0)            # (B,T,E)
    layer_in = embeds
    h_fin, c_fin = [], []
    for l in range(params.n_layers):
        w_ih, w_hh, b_ih, b_hh = params.lstm[l]
        h, c = h0_all[l], c0_all[l]
        outs = []
        for t in range(T):
            x_t = layer_in[:, t, :]
            gates = x_t @ w_ih.T + b_ih + h @ w_hh.T + b_hh
            i = jax.nn.sigmoid(gates[:, :H])
            f = jax.nn.sigmoid(gates[:, H:2 * H])
            g = jnp.tanh(gates[:, 2 * H:3 * H])
            o = jax.nn.sigmoid(gates[:, 3 * H:])
            c = f * c + i * g
            h = o * jnp.tanh(c)
            outs.append(h)
        layer_in = jnp.stack(outs, axis=1)
        h_fin.append(h)
        c_fin.append(c)
    out = layer_in.reshape(-1, H) @ params.w_fc.T + params.b_fc
    sig = jax.nn.sigmoid(out).reshape(B, -1)[:, -1]
    return sig, (jnp.stack(h_fin), jnp.stack(c_fin))


if __name__ == "__main__":
    # Small, (8,128)-friendly test shapes.
    vocab_size = 100
    embedding_dim = 32
    hidden_dim = 32
    n_layers = 2
    output_size = 1
    batch = 2
    seq_len = 8

    key = jax.random.PRNGKey(0)
    pkey, xkey = jax.random.split(key)

    params = SentimentRNNParams(pkey, vocab_size, output_size,
                                embedding_dim, hidden_dim, n_layers)
    x = jax.random.randint(xkey, (batch, seq_len), 0, vocab_size, jnp.int32)
    hidden = params.init_hidden(batch)

    sig_out, (h_n, c_n) = sentiment_rnn_forward(params, x, hidden)
    jax.block_until_ready((sig_out, h_n, c_n))

    assert sig_out.shape == (batch,)
    assert h_n.shape == (n_layers, batch, hidden_dim)
    assert c_n.shape == (n_layers, batch, hidden_dim)
    assert bool(jnp.all(jnp.isfinite(sig_out)))

    # Validate against the pure-JAX f32 reference (bf16 matmul operands =>
    # loose absolute tolerance).
    ref_sig, (ref_h, ref_c) = _reference_forward(params, x, hidden)
    assert float(jnp.max(jnp.abs(sig_out - ref_sig))) < 5e-2
    assert float(jnp.max(jnp.abs(h_n - ref_h))) < 5e-2
    assert float(jnp.max(jnp.abs(c_n - ref_c))) < 5e-2

    print("KERNEL_OK")
</pallas_src>

<mosaic_0001>
module attributes {stable_mosaic.version = 11 : i64} {
  func.func @_proj_kernel(%arg0: i32, %arg1: memref<64x32xbf16, #tpu.memory_space<vmem>>, %arg2: memref<32x128xbf16, #tpu.memory_space<vmem>>, %arg3: memref<1x128xf32, #tpu.memory_space<vmem>>, %arg4: memref<64x128xf32, #tpu.memory_space<vmem>>) attributes {dimension_semantics = [#tpu.dimension_semantics<parallel>], iteration_bounds = array<i64: 1>, scalar_prefetch = 0 : i64, scratch_operands = 0 : i64, tpu.core_type = #tpu.core_type<tc>, window_params = [{transform_indices = @transform_0, window_bounds = array<i64: 64, 32>}, {pipeline_mode = #tpu.pipeline_mode<synchronous>, transform_indices = @transform_1, window_bounds = array<i64: 32, 128>}, {pipeline_mode = #tpu.pipeline_mode<synchronous>, transform_indices = @transform_2, window_bounds = array<i64: 1, 128>}, {transform_indices = @transform_3, window_bounds = array<i64: 64, 128>}]} {
    %c0 = arith.constant 0 : index
    %c0_0 = arith.constant 0 : index
    %0 = vector.load %arg1[%c0, %c0_0] : memref<64x32xbf16, #tpu.memory_space<vmem>>, vector<64x32xbf16>
    %c0_1 = arith.constant 0 : index
    %c0_2 = arith.constant 0 : index
    %1 = vector.load %arg2[%c0_1, %c0_2] : memref<32x128xbf16, #tpu.memory_space<vmem>>, vector<32x128xbf16>
    %cst = arith.constant dense<0.000000e+00> : vector<64x128xf32>
    %2 = tpu.matmul %0, %1, %cst {dimension_numbers = #tpu.dot_dimension_numbers<[1], [0], [0], [1], [0, 0, 1, 1], [], []>} : vector<64x32xbf16>, vector<32x128xbf16>, vector<64x128xf32> -> vector<64x128xf32>
    %c0_3 = arith.constant 0 : index
    %c0_4 = arith.constant 0 : index
    %3 = vector.load %arg3[%c0_3, %c0_4] : memref<1x128xf32, #tpu.memory_space<vmem>>, vector<1x128xf32>
    %4 = vector.broadcast %3 : vector<1x128xf32> to vector<64x128xf32>
    %5 = arith.addf %2, %4 : vector<64x128xf32>
    %c0_5 = arith.constant 0 : index
    %c0_6 = arith.constant 0 : index
    %6 = vector.load %arg4[%c0_5, %c0_6] : memref<64x128xf32, #tpu.memory_space<vmem>>, vector<64x128xf32>
    tpu.vector_store %arg4[%c0_5, %c0_6], %5 {strides = array<i32>} : memref<64x128xf32, #tpu.memory_space<vmem>>, vector<64x128xf32>,
    return
  }
  func.func @transform_0(%arg0: i32) -> (i32, i32) {
    %c0_i32 = arith.constant 0 : i32
    %c0_i32_0 = arith.constant 0 : i32
    return %arg0, %c0_i32 : i32, i32
  }
  func.func @transform_1(%arg0: i32) -> (i32, i32) {
    %c0_i32 = arith.constant 0 : i32
    %c0_i32_0 = arith.constant 0 : i32
    %c0_i32_1 = arith.constant 0 : i32
    return %c0_i32, %c0_i32_0 : i32, i32
  }
  func.func @transform_2(%arg0: i32) -> (i32, i32) {
    %c0_i32 = arith.constant 0 : i32
    %c0_i32_0 = arith.constant 0 : i32
    %c0_i32_1 = arith.constant 0 : i32
    return %c0_i32, %c0_i32_0 : i32, i32
  }
  func.func @transform_3(%arg0: i32) -> (i32, i32) {
    %c0_i32 = arith.constant 0 : i32
    %c0_i32_0 = arith.constant 0 : i32
    return %arg0, %c0_i32 : i32, i32
  }
}

</mosaic_0001>

<bundles_post_ra>
// kernel: tpu_custom_call.1
= control target key start
LH: loop header
LB: loop body
LE: loop exit
PB: predicated region body
PF: predicated region fallthrough
CT: control target
= control target key end

     0   :  { %vm67_vm0 = vcmask 261120   ;;  %s291_s0 = inlined_call_operand.vmem [shape: bf16[64,32], index: 0, kind: input, shape index: {}]   ;;  %s292_s1 = inlined_call_operand.vmem [shape: bf16[32,128], index: 1, kind: input, shape index: {}]   ;;  %s293_s2 = inlined_call_operand.vmem [shape: f32[1,128], index: 2, kind: input, shape index: {}]   ;;  %s294_s3 = inlined_call_operand.hbm [shape: f32[64,128], index: 3, kind: output, shape index: {}]  }
   0x1   :  { %v205_v0 = vld [vmem:[%s292_s1] sm:$0xff]   ;;  %v206_v1 = vld [vmem:[%s292_s1 + $0x8] sm:$0xff]   ;;  %v208_v3 = vld [vmem:[%s291_s0 + $0x10] sm:$0xff]  }
   0x2   :  { %186 = vmatprep.subr.bf16.mxu0 %v205_v0  ;;  %198 = vmatprep.subr.bf16.mxu1 %v205_v0  ;;  %v207_v2 = vld [vmem:[%s291_s0] sm:$0xff]   ;;  %v209_v4 = vld [vmem:[%s291_s0 + $0x8] sm:$0xff]   ;;  %v210_v5 = vld [vmem:[%s291_s0 + $0x18] sm:$0xff]  }
   0x3   :  { %187 = vmatpush3.bf16.msra.mxu0 %v205_v0  ;;  %200 = vmatpush3.bf16.msra.mxu1 %v205_v0 }
   0x4   :  { %188 = vmatprep.subr.bf16.mxu0 %v206_v1  ;;  %199 = vmatprep.subr.bf16.mxu1 %v206_v1 }
   0x5   :  { %190 = vmatprep.mubr.msk.bf16.mxu0 %vm67_vm0, %v207_v2  ;;  %194 = vmatprep.mubr.msk.bf16.mxu1 %vm67_vm0, %v208_v3 }
   0x6   :  { %8 = vsyncpa [#allocation3], 0  ;;  %v169_v6 = vld [vmem:[%s293_s2] ss:$0 sm:$0xff]  ;;  %s235_s25 = smov [#allocation2]  }
   0x7   :  { %189 = vmatpush3.bf16.msra.mxu0 %v206_v1  ;;  %201 = vmatpush3.bf16.msra.mxu1 %v206_v1  ;;  %s158_s26 = sshll.u32 %s235_s25, 4  ;;  %s159_s26 = int_to_ptr.vmem [resolvable:$true] %s158_s26 }
   0x8   :  { %s211_s0 = scalar_lea.vmem %s159_s26, 1024  ;;  %p216_p1 = scmp.lt.s32.totalorder %s159_s26, %s159_s26 }
   0x9   :  { %p212_p0 = scmp.ne.s32.totalorder %s159_s26, %s211_s0  ;;  %p217_p2 = scmp.lt.s32.totalorder %s211_s0, %s211_s0 }
   0xa   :  { %191 = vmatmul.mubr.msk.bf16.vlgmr.msra.gmra.mrb[0].mxu0 %vm67_vm0, %v209_v4  ;;  %195 = vmatmul.mubr.msk.bf16.vlgmr.msra.gmra.mrb[0].mxu1 %vm67_vm0, %v210_v5 }
   0xb   :  { %p218_p3 = por %p217_p2, %p216_p1 }
   0xd   :  { %p219_p4 = pnand %p218_p3, %p212_p0 }
  0xdd   :  { %v192_v7 = vpop.f32.mrb[0].mxu0  ;;  %v196_v8 = vpop.f32.mrb[0].mxu1 }
  0xde   :  { %v123_v9 = vadd.f32 %v192_v7, %v169_v6  ;;  %v139_v10 = vadd.f32 %v196_v8, %v169_v6  ;;  %v114_v11 = vpop.f32.mrb[1].mxu0  ;;  %v130_v12 = vpop.f32.mrb[1].mxu1 }
  0xdf   :  { %v115_v13 = vadd.f32 %v169_v6, %v114_v11  ;;  %v131_v14 = vadd.f32 %v169_v6, %v130_v12  ;;  %v193_v15 = vpop.f32.mrb[2].mxu0  ;;  %v197_v16 = vpop.f32.mrb[2].mxu1 }
  0xe0   :  { %147 = vst [vmem:[#allocation2 + $0x10] sm:$0xff] %v123_v9  ;;  %151 = vst [vmem:[#allocation2 + $0x30] sm:$0xff] %v139_v10  ;;  %v126_v17 = vadd.f32 %v193_v15, %v169_v6  ;;  %v142_v18 = vadd.f32 %v197_v16, %v169_v6  ;;  %v117_v19 = vpop.f32.mrb[3].mxu0  ;;  %v133_v20 = vpop.f32.mrb[3].mxu1 }
  0xe1   :  { %145 = vst [vmem:[#allocation2] sm:$0xff] %v115_v13  ;;  %149 = vst [vmem:[#allocation2 + $0x20] sm:$0xff] %v131_v14  ;;  %v118_v21 = vadd.f32 %v169_v6, %v117_v19  ;;  %v134_v22 = vadd.f32 %v169_v6, %v133_v20 }
  0xe2   :  { %148 = vst [vmem:[#allocation2 + $0x18] sm:$0xff] %v126_v17  ;;  %152 = vst [vmem:[#allocation2 + $0x38] sm:$0xff] %v142_v18 }
  0xe3   :  { %146 = vst [vmem:[#allocation2 + $0x8] sm:$0xff] %v118_v21  ;;  %150 = vst [vmem:[#allocation2 + $0x28] sm:$0xff] %v134_v22 }
  0xe4   :  { %222 = shalt.err (!%p219_p4)
}
  0xe5   :  { %s223_s28 = scalar_lea.hbm %s294_s3, 1024 }
  0xe6   :  { %p224_p5 = scmp.ne.s32.totalorder %s294_s3, %s223_s28  ;;  %p227_p6 = scmp.lt.u32.totalorder %s223_s28, %s294_s3 }
  0xe8   :  { %p229_p7 = pnand %p227_p6, %p224_p5 }
  0xea   :  { %232 = shalt.err (!%p229_p7)
}
  0xeb   :  { %s236_s6 = smov 128   ;;  %s237_s7 = smov 8  }
  0xec   :  { %164 = dma.vmem_to_hbm [thread:$0]  %s159_s26, 1024, %s294_s3, [#allocation3], %s236_s6, %s236_s6, %s237_s7  }
  0xed   :  { %233 = dma.done.wait [#allocation3], 1024  }
  0xee   :  { %234 = vsyncadd [#allocation3], 4294966272 }
  0xef   :  { %168 = vsyncpa [#allocation3], 1 }

</bundles_post_ra>
